<compile_context>
chip_gen: v7x
topology: tpu7x:2x2x1
jax: 0.10.0
libtpu: 0.0.40
codegen_flags: <defaults>
</compile_context>

<pallas_src>
import jax
import jax.numpy as jnp
from jax.experimental import pallas as pl
from jax.experimental.pallas import tpu as pltpu

_LN_EPS = 1e-5


def _layernorm_affine(y, gamma, beta):
    """LayerNorm over the last dim (f32 in/out), fused one-pass statistics."""
    inv_c = 1.0 / y.shape[-1]
    s1 = jnp.sum(y, axis=-1, keepdims=True)
    s2 = jnp.sum(y * y, axis=-1, keepdims=True)
    mean = s1 * inv_c
    var = s2 * inv_c - mean * mean
    yn = (y - mean) * jax.lax.rsqrt(var + _LN_EPS)
    return yn * gamma + beta


def _ff_kernel_single(x_ref, w1_ref, b1_ref, w2_ref, b2_ref, g_ref, beta_ref,
                      o_ref):
    # Whole hidden dim resident: no reduction axis, no accumulator scratch.
    h = jnp.dot(x_ref[...], w1_ref[...], preferred_element_type=jnp.float32)
    h = h + b1_ref[...].astype(jnp.float32)
    h = h * jax.nn.sigmoid(h)                           # SiLU / Swish (EUP)
    y = jnp.dot(h.astype(w2_ref.dtype), w2_ref[...],
                preferred_element_type=jnp.float32)
    y = y + b2_ref[...].astype(jnp.float32)
    y = _layernorm_affine(y, g_ref[...].astype(jnp.float32),
                          beta_ref[...].astype(jnp.float32))
    o_ref[...] = y.astype(o_ref.dtype)


def _ff_kernel_multi(x_ref, w1_ref, b1_ref, w2_ref, b2_ref, g_ref, beta_ref,
                     o_ref, acc_ref):
    # x_ref : (tm, C)   w1_ref: (C, th)  b1_ref: (1, th)
    # w2_ref: (th, C)   b2_ref: (1, C)   g_ref/beta_ref: (1, C)
    # o_ref : (tm, C)   acc_ref: (tm, C) f32 scratch (partial y)
    k = pl.program_id(1)

    h = jnp.dot(x_ref[...], w1_ref[...], preferred_element_type=jnp.float32)
    h = h + b1_ref[...].astype(jnp.float32)
    h = h * jax.nn.sigmoid(h)                           # SiLU / Swish (EUP)
    partial = jnp.dot(h.astype(w2_ref.dtype), w2_ref[...],
                      preferred_element_type=jnp.float32)

    @pl.when(k == 0)
    def _():
        acc_ref[...] = partial                          # no zero-fill pass

    @pl.when(k > 0)
    def _():
        acc_ref[...] = acc_ref[...] + partial

    @pl.when(k == pl.num_programs(1) - 1)
    def _():
        y = acc_ref[...] + b2_ref[...].astype(jnp.float32)
        y = _layernorm_affine(y, g_ref[...].astype(jnp.float32),
                              beta_ref[...].astype(jnp.float32))
        o_ref[...] = y.astype(o_ref.dtype)


def _round_up(x, m):
    return (x + m - 1) // m * m


def _pick_th(H, max_th=2048):
    """Hidden-dim chunk: full H if small, else a 128-multiple divisor."""
    if H <= max_th:
        return H
    for cand in range(max_th, 127, -128):
        if H % cand == 0:
            return cand
    return H


def _pick_tm(M, C, th, itemsize, vmem_budget_bytes):
    """Pick row tile tm so the working set fits the VMEM budget."""
    # Resident operands (double-buffered by the default pipeline).
    fixed = 2 * (C * th + th * C + th + 3 * C) * itemsize
    # Per-row cost: double-buffered x & out tiles + f32 h chunk + f32 y/acc.
    per_row = 4 * C * itemsize + th * 4 + 2 * C * 4
    avail = vmem_budget_bytes - fixed
    tm = avail // per_row if avail > 0 else 0
    tm = max(min(int(tm), 1024), 128)
    tm = (tm // 128) * 128                  # multiple of 128 in [128, 1024]
    tm = min(tm, _round_up(M, 8))           # never larger than (padded) M
    tm = _round_up(tm, 8)
    vmem_est = fixed + per_row * max(tm, 8)
    return tm, vmem_est


def positionwise_ff(x, w1, b1, w2, b2, gamma, beta, *, tm=None, th=None,
                    vmem_budget_bytes=32 * 1024 * 1024):
    """x: (B, T, C); w1: (C, H) (= W1^T); w2: (H, C) (= W2^T);
    b1: (H,); b2 / gamma / beta: (C,)."""
    B, T, C = x.shape
    H = w1.shape[1]
    M = B * T
    itemsize = jnp.dtype(x.dtype).itemsize

    if th is None:
        th = _pick_th(H)
    assert H % th == 0, "hidden chunk must divide hidden size"
    auto_tm, vmem_est = _pick_tm(M, C, th, itemsize, vmem_budget_bytes)
    if tm is None:
        tm = auto_tm
    tm = _round_up(min(tm, _round_up(M, 8)), 8)

    M_pad = _round_up(M, tm)
    x2 = x.reshape(M, C)
    if M_pad != M:
        x2 = jnp.pad(x2, ((0, M_pad - M), (0, 0)))

    b1_2 = b1.reshape(1, H)
    b2_2 = b2.reshape(1, C)
    g_2 = gamma.reshape(1, C)
    be_2 = beta.reshape(1, C)

    n_k = H // th
    # Keep the scoped limit safely under v7x's 64 MiB physical VMEM.
    vmem_limit = int(min(max(1.5 * vmem_est, 32 * 2**20), 56 * 2**20))

    cost = pl.CostEstimate(
        flops=4 * M * C * H,                               # two matmuls
        transcendentals=M * H,                             # sigmoid in SiLU
        bytes_accessed=(2 * M * C + 2 * C * H + H + 3 * C) * itemsize,
    )

    # TODO(synk): single-buffer the constant-index weight specs with
    # pipeline_mode=pl.Buffered(1) once verified stable on the deployed jax;
    # this would halve their fixed VMEM footprint (DMA already happens once).
    if n_k == 1:
        kernel = _ff_kernel_single
        grid_spec = pltpu.PrefetchScalarGridSpec(
            num_scalar_prefetch=0,
            grid=(M_pad // tm,),
            in_specs=[
                pl.BlockSpec((tm, C), lambda i: (i, 0)),   # x rows
                pl.BlockSpec((C, H), lambda i: (0, 0)),    # W1 (resident)
                pl.BlockSpec((1, H), lambda i: (0, 0)),    # b1
                pl.BlockSpec((H, C), lambda i: (0, 0)),    # W2 (resident)
                pl.BlockSpec((1, C), lambda i: (0, 0)),    # b2
                pl.BlockSpec((1, C), lambda i: (0, 0)),    # gamma
                pl.BlockSpec((1, C), lambda i: (0, 0)),    # beta
            ],
            out_specs=pl.BlockSpec((tm, C), lambda i: (i, 0)),
            scratch_shapes=[],
        )
        dim_sem = ("parallel",)
    else:
        kernel = _ff_kernel_multi
        grid_spec = pltpu.PrefetchScalarGridSpec(
            num_scalar_prefetch=0,
            grid=(M_pad // tm, n_k),                       # reduction axis last
            in_specs=[
                pl.BlockSpec((tm, C), lambda i, k: (i, 0)),   # x rows
                pl.BlockSpec((C, th), lambda i, k: (0, k)),   # W1 chunk
                pl.BlockSpec((1, th), lambda i, k: (0, k)),   # b1 chunk
                pl.BlockSpec((th, C), lambda i, k: (k, 0)),   # W2 chunk
                pl.BlockSpec((1, C), lambda i, k: (0, 0)),    # b2
                pl.BlockSpec((1, C), lambda i, k: (0, 0)),    # gamma
                pl.BlockSpec((1, C), lambda i, k: (0, 0)),    # beta
            ],
            out_specs=pl.BlockSpec((tm, C), lambda i, k: (i, 0)),
            scratch_shapes=[pltpu.VMEM((tm, C), jnp.float32)],
        )
        dim_sem = ("parallel", "arbitrary")

    out = pl.pallas_call(
        kernel,
        out_shape=jax.ShapeDtypeStruct((M_pad, C), x.dtype),
        grid_spec=grid_spec,
        compiler_params=pltpu.CompilerParams(
            dimension_semantics=dim_sem,
            vmem_limit_bytes=vmem_limit,
        ),
        cost_estimate=cost,
    )(x2, w1, b1_2, w2, b2_2, g_2, be_2)

    return out[:M].reshape(B, T, C)


def _reference(x, w1, b1, w2, b2, gamma, beta):
    h = x.astype(jnp.float32) @ w1 + b1
    h = h * jax.nn.sigmoid(h)
    y = h @ w2 + b2
    mean = jnp.mean(y, axis=-1, keepdims=True)
    var = jnp.mean(jnp.square(y - mean), axis=-1, keepdims=True)
    y = (y - mean) * jax.lax.rsqrt(var + _LN_EPS)
    return (y * gamma + beta).astype(x.dtype)


if __name__ == "__main__":
    # Small but lane-dense shapes (C, H multiples of 128 avoid masked stores).
    B, T, C, H = 2, 8, 128, 256   # batch, seq, embed_dim, hidden_size

    key = jax.random.PRNGKey(0)
    kx, k1, k2, k3, k4 = jax.random.split(key, 5)

    x = jax.random.normal(kx, (B, T, C), dtype=jnp.float32)

    # Deterministic "PyTorch-like" Linear init (uniform +/- 1/sqrt(fan_in)).
    lim1 = 1.0 / (C ** 0.5)
    w1 = jax.random.uniform(k1, (C, H), jnp.float32, -lim1, lim1)   # = W1^T
    b1 = jax.random.uniform(k2, (H,), jnp.float32, -lim1, lim1)
    lim2 = 1.0 / (H ** 0.5)
    w2 = jax.random.uniform(k3, (H, C), jnp.float32, -lim2, lim2)   # = W2^T
    b2 = jax.random.uniform(k4, (C,), jnp.float32, -lim2, lim2)

    gamma = jnp.ones((C,), jnp.float32)   # LayerNorm affine init
    beta = jnp.zeros((C,), jnp.float32)

    ref = _reference(x, w1, b1, w2, b2, gamma, beta)

    # Fast path: whole hidden dim resident (1-D grid, no scratch).
    out1 = jax.block_until_ready(
        positionwise_ff(x, w1, b1, w2, b2, gamma, beta))
    assert out1.shape == (B, T, C)
    assert jnp.allclose(out1, ref, atol=1e-4, rtol=1e-4), \
        float(jnp.max(jnp.abs(out1 - ref)))

    # Reduction path: force hidden-dim chunking (th < H) to exercise the
    # accumulator kernel used for large hidden sizes.
    out2 = jax.block_until_ready(
        positionwise_ff(x, w1, b1, w2, b2, gamma, beta, th=128))
    assert jnp.allclose(out2, ref, atol=1e-4, rtol=1e-4), \
        float(jnp.max(jnp.abs(out2 - ref)))

    print("KERNEL_OK")
</pallas_src>

<mosaic_0001>
module attributes {stable_mosaic.version = 11 : i64} {
  func.func @_ff_kernel_single(%arg0: i32, %arg1: memref<16x128xf32, #tpu.memory_space<vmem>>, %arg2: memref<128x256xf32, #tpu.memory_space<vmem>>, %arg3: memref<1x256xf32, #tpu.memory_space<vmem>>, %arg4: memref<256x128xf32, #tpu.memory_space<vmem>>, %arg5: memref<1x128xf32, #tpu.memory_space<vmem>>, %arg6: memref<1x128xf32, #tpu.memory_space<vmem>>, %arg7: memref<1x128xf32, #tpu.memory_space<vmem>>, %arg8: memref<16x128xf32, #tpu.memory_space<vmem>>) attributes {dimension_semantics = [#tpu.dimension_semantics<parallel>], iteration_bounds = array<i64: 1>, scalar_prefetch = 0 : i64, scratch_operands = 0 : i64, tpu.core_type = #tpu.core_type<tc>, window_params = [{transform_indices = @transform_0, window_bounds = array<i64: 16, 128>}, {pipeline_mode = #tpu.pipeline_mode<synchronous>, transform_indices = @transform_1, window_bounds = array<i64: 128, 256>}, {pipeline_mode = #tpu.pipeline_mode<synchronous>, transform_indices = @transform_2, window_bounds = array<i64: 1, 256>}, {pipeline_mode = #tpu.pipeline_mode<synchronous>, transform_indices = @transform_3, window_bounds = array<i64: 256, 128>}, {pipeline_mode = #tpu.pipeline_mode<synchronous>, transform_indices = @transform_4, window_bounds = array<i64: 1, 128>}, {pipeline_mode = #tpu.pipeline_mode<synchronous>, transform_indices = @transform_5, window_bounds = array<i64: 1, 128>}, {pipeline_mode = #tpu.pipeline_mode<synchronous>, transform_indices = @transform_6, window_bounds = array<i64: 1, 128>}, {transform_indices = @transform_7, window_bounds = array<i64: 16, 128>}]} {
    %c0 = arith.constant 0 : index
    %c0_0 = arith.constant 0 : index
    %0 = vector.load %arg1[%c0, %c0_0] : memref<16x128xf32, #tpu.memory_space<vmem>>, vector<16x128xf32>
    %c0_1 = arith.constant 0 : index
    %c0_2 = arith.constant 0 : index
    %1 = vector.load %arg2[%c0_1, %c0_2] : memref<128x256xf32, #tpu.memory_space<vmem>>, vector<128x256xf32>
    %cst = arith.constant dense<0.000000e+00> : vector<16x256xf32>
    %2 = tpu.matmul %0, %1, %cst {dimension_numbers = #tpu.dot_dimension_numbers<[1], [0], [0], [1], [0, 0, 1, 1], [], []>} : vector<16x128xf32>, vector<128x256xf32>, vector<16x256xf32> -> vector<16x256xf32>
    %c0_3 = arith.constant 0 : index
    %c0_4 = arith.constant 0 : index
    %3 = vector.load %arg3[%c0_3, %c0_4] : memref<1x256xf32, #tpu.memory_space<vmem>>, vector<1x256xf32>
    %4 = vector.broadcast %3 : vector<1x256xf32> to vector<16x256xf32>
    %5 = arith.addf %2, %4 : vector<16x256xf32>
    %6 = arith.negf %5 : vector<16x256xf32>
    %7 = math.exp %6 : vector<16x256xf32>
    %cst_5 = arith.constant 1.000000e+00 : f32
    %8 = vector.broadcast %cst_5 : f32 to vector<16x256xf32>
    %9 = arith.addf %8, %7 : vector<16x256xf32>
    %10 = arith.divf %8, %9 : vector<16x256xf32>
    %11 = arith.mulf %5, %10 : vector<16x256xf32>
    %c0_6 = arith.constant 0 : index
    %c0_7 = arith.constant 0 : index
    %12 = vector.load %arg4[%c0_6, %c0_7] : memref<256x128xf32, #tpu.memory_space<vmem>>, vector<256x128xf32>
    %cst_8 = arith.constant dense<0.000000e+00> : vector<16x128xf32>
    %13 = tpu.matmul %11, %12, %cst_8 {dimension_numbers = #tpu.dot_dimension_numbers<[1], [0], [0], [1], [0, 0, 1, 1], [], []>} : vector<16x256xf32>, vector<256x128xf32>, vector<16x128xf32> -> vector<16x128xf32>
    %c0_9 = arith.constant 0 : index
    %c0_10 = arith.constant 0 : index
    %14 = vector.load %arg5[%c0_9, %c0_10] : memref<1x128xf32, #tpu.memory_space<vmem>>, vector<1x128xf32>
    %15 = vector.broadcast %14 : vector<1x128xf32> to vector<16x128xf32>
    %16 = arith.addf %13, %15 : vector<16x128xf32>
    %c0_11 = arith.constant 0 : index
    %c0_12 = arith.constant 0 : index
    %17 = vector.load %arg6[%c0_11, %c0_12] : memref<1x128xf32, #tpu.memory_space<vmem>>, vector<1x128xf32>
    %c0_13 = arith.constant 0 : index
    %c0_14 = arith.constant 0 : index
    %18 = vector.load %arg7[%c0_13, %c0_14] : memref<1x128xf32, #tpu.memory_space<vmem>>, vector<1x128xf32>
    %cst_15 = arith.constant dense<0.000000e+00> : vector<16xf32>
    %19 = vector.multi_reduction <add>, %16, %cst_15 [1] : vector<16x128xf32> to vector<16xf32>
    %20 = vector.shape_cast %19 : vector<16xf32> to vector<16x1xf32>
    %21 = arith.mulf %16, %16 : vector<16x128xf32>
    %cst_16 = arith.constant dense<0.000000e+00> : vector<16xf32>
    %22 = vector.multi_reduction <add>, %21, %cst_16 [1] : vector<16x128xf32> to vector<16xf32>
    %23 = vector.shape_cast %22 : vector<16xf32> to vector<16x1xf32>
    %cst_17 = arith.constant 7.812500e-03 : f32
    %24 = vector.broadcast %cst_17 : f32 to vector<16x1xf32>
    %25 = arith.mulf %20, %24 : vector<16x1xf32>
    %cst_18 = arith.constant 7.812500e-03 : f32
    %26 = vector.broadcast %cst_18 : f32 to vector<16x1xf32>
    %27 = arith.mulf %23, %26 : vector<16x1xf32>
    %28 = arith.mulf %25, %25 : vector<16x1xf32>
    %29 = arith.subf %27, %28 : vector<16x1xf32>
    %30 = vector.broadcast %25 : vector<16x1xf32> to vector<16x128xf32>
    %31 = arith.subf %16, %30 : vector<16x128xf32>
    %cst_19 = arith.constant 9.99999974E-6 : f32
    %32 = vector.broadcast %cst_19 : f32 to vector<16x1xf32>
    %33 = arith.addf %29, %32 : vector<16x1xf32>
    %34 = math.rsqrt %33 : vector<16x1xf32>
    %35 = vector.broadcast %34 : vector<16x1xf32> to vector<16x128xf32>
    %36 = arith.mulf %31, %35 : vector<16x128xf32>
    %37 = vector.broadcast %17 : vector<1x128xf32> to vector<16x128xf32>
    %38 = arith.mulf %36, %37 : vector<16x128xf32>
    %39 = vector.broadcast %18 : vector<1x128xf32> to vector<16x128xf32>
    %40 = arith.addf %38, %39 : vector<16x128xf32>
    %c0_20 = arith.constant 0 : index
    %c0_21 = arith.constant 0 : index
    %41 = vector.load %arg8[%c0_20, %c0_21] : memref<16x128xf32, #tpu.memory_space<vmem>>, vector<16x128xf32>
    tpu.vector_store %arg8[%c0_20, %c0_21], %40 {strides = array<i32>} : memref<16x128xf32, #tpu.memory_space<vmem>>, vector<16x128xf32>,
    return
  }
  func.func @transform_0(%arg0: i32) -> (i32, i32) {
    %c0_i32 = arith.constant 0 : i32
    %c0_i32_0 = arith.constant 0 : i32
    return %arg0, %c0_i32 : i32, i32
  }
  func.func @transform_1(%arg0: i32) -> (i32, i32) {
    %c0_i32 = arith.constant 0 : i32
    %c0_i32_0 = arith.constant 0 : i32
    %c0_i32_1 = arith.constant 0 : i32
    return %c0_i32, %c0_i32_0 : i32, i32
  }
  func.func @transform_2(%arg0: i32) -> (i32, i32) {
    %c0_i32 = arith.constant 0 : i32
    %c0_i32_0 = arith.constant 0 : i32
    %c0_i32_1 = arith.constant 0 : i32
    return %c0_i32, %c0_i32_0 : i32, i32
  }
  func.func @transform_3(%arg0: i32) -> (i32, i32) {
    %c0_i32 = arith.constant 0 : i32
    %c0_i32_0 = arith.constant 0 : i32
    %c0_i32_1 = arith.constant 0 : i32
    return %c0_i32, %c0_i32_0 : i32, i32
  }
  func.func @transform_4(%arg0: i32) -> (i32, i32) {
    %c0_i32 = arith.constant 0 : i32
    %c0_i32_0 = arith.constant 0 : i32
    %c0_i32_1 = arith.constant 0 : i32
    return %c0_i32, %c0_i32_0 : i32, i32
  }
  func.func @transform_5(%arg0: i32) -> (i32, i32) {
    %c0_i32 = arith.constant 0 : i32
    %c0_i32_0 = arith.constant 0 : i32
    %c0_i32_1 = arith.constant 0 : i32
    return %c0_i32, %c0_i32_0 : i32, i32
  }
  func.func @transform_6(%arg0: i32) -> (i32, i32) {
    %c0_i32 = arith.constant 0 : i32
    %c0_i32_0 = arith.constant 0 : i32
    %c0_i32_1 = arith.constant 0 : i32
    return %c0_i32, %c0_i32_0 : i32, i32
  }
  func.func @transform_7(%arg0: i32) -> (i32, i32) {
    %c0_i32 = arith.constant 0 : i32
    %c0_i32_0 = arith.constant 0 : i32
    return %arg0, %c0_i32 : i32, i32
  }
}

</mosaic_0001>

<bundles_post_ra>
// kernel: tpu_custom_call.1
= control target key start
LH: loop header
LB: loop body
LE: loop exit
PB: predicated region body
PF: predicated region fallthrough
CT: control target
= control target key end

     0   :  { %12 = vsyncpa [#allocation3], 0  ;;  %s749_s0 = inlined_call_operand.hbm [shape: f32[16,128], index: 0, kind: input, shape index: {}]   ;;  %s750_s1 = inlined_call_operand.hbm [shape: f32[128,256], index: 1, kind: input, shape index: {}]   ;;  %s751_s2 = inlined_call_operand.vmem [shape: f32[1,256], index: 2, kind: input, shape index: {}]   ;;  %s752_s3 = inlined_call_operand.hbm [shape: f32[256,128], index: 3, kind: input, shape index: {}]   ;;  %s753_s4 = inlined_call_operand.vmem [shape: f32[1,128], index: 4, kind: input, shape index: {}]   ;;  %s754_s5 = inlined_call_operand.vmem [shape: f32[1,128], index: 5, kind: input, shape index: {}]   ;;  %s755_s6 = inlined_call_operand.vmem [shape: f32[1,128], index: 6, kind: input, shape index: {}]   ;;  %s756_s7 = inlined_call_operand.hbm [shape: f32[16,128], index: 7, kind: output, shape index: {}]  }
   0x1   :  { %13 = vsyncpa [#allocation6], 0 }
   0x2   :  { %14 = vsyncpa [#allocation4], 0  ;;  %s629_s24 = smov [#allocation5]   ;;  %s535_s28 = scalar_lea.hbm %s750_s1, 4096 }
   0x3   :  { %s32_s25 = sshll.u32 %s629_s24, 4  ;;  %p536_p0 = scmp.ne.s32.totalorder %s750_s1, %s535_s28  ;;  %s33_s25 = int_to_ptr.vmem [resolvable:$true] %s32_s25 }
   0x4   :  { %p539_p1 = scmp.lt.u32.totalorder %s535_s28, %s750_s1 }
   0x6   :  { %p541_p2 = pnand %p539_p1, %p536_p0 }
   0x8   :  { %544 = shalt.err (!%p541_p2)
}
   0x9   :  { %s545_s10 = scalar_lea.vmem %s33_s25, 4096  ;;  %p550_p4 = scmp.lt.s32.totalorder %s33_s25, %s33_s25 }
   0xa   :  { %p546_p3 = scmp.ne.s32.totalorder %s33_s25, %s545_s10  ;;  %p551_p5 = scmp.lt.s32.totalorder %s545_s10, %s545_s10 }
   0xc   :  { %p552_p6 = por %p551_p5, %p550_p4 }
   0xe   :  { %p553_p7 = pnand %p552_p6, %p546_p3 }
  0x10   :  { %556 = shalt.err (!%p553_p7)
}
  0x11   :  { %s630_s11 = smov 256   ;;  %s631_s12 = smov 16  }
  0x12   :  { %38 = dma.hbm_to_vmem [thread:$0]  %s750_s1, 4096, %s33_s25, [#allocation6], %s630_s11, %s630_s11, %s631_s12  }
  0x13   :  { %s632_s15 = smov [#allocation2]   ;;  %s557_s19 = scalar_lea.hbm %s749_s0, 256 }
  0x14   :  { %s20_s16 = sshll.u32 %s632_s15, 4  ;;  %p558_p8 = scmp.ne.s32.totalorder %s749_s0, %s557_s19  ;;  %s21_s16 = int_to_ptr.vmem [resolvable:$true] %s20_s16 }
  0x15   :  { %p561_p9 = scmp.lt.u32.totalorder %s557_s19, %s749_s0 }
  0x17   :  { %p563_p10 = pnand %p561_p9, %p558_p8 }
  0x19   :  { %566 = shalt.err (!%p563_p10)
}
  0x1a   :  { %s567_s24 = scalar_lea.vmem %s21_s16, 256  ;;  %p572_p12 = scmp.lt.s32.totalorder %s21_s16, %s21_s16 }
  0x1b   :  { %p568_p11 = scmp.ne.s32.totalorder %s21_s16, %s567_s24  ;;  %p573_p13 = scmp.lt.s32.totalorder %s567_s24, %s567_s24 }
  0x1d   :  { %p574_p0 = por %p573_p13, %p572_p12 }
  0x1f   :  { %p575_p1 = pnand %p574_p0, %p568_p11 }
  0x21   :  { %578 = shalt.err (!%p575_p1)
}
  0x22   :  { %s633_s1 = smov 128   ;;  %s634_s25 = smov 8  }
  0x23   :  { %26 = dma.hbm_to_vmem [thread:$0]  %s749_s0, 256, %s21_s16, [#allocation3], %s633_s1, %s633_s1, %s634_s25  }
  0x24   :  { %s635_s28 = smov [#allocation7]   ;;  %s579_s9 = scalar_lea.hbm %s752_s3, 4096 }
  0x25   :  { %s46_s29 = sshll.u32 %s635_s28, 4  ;;  %p580_p2 = scmp.ne.s32.totalorder %s752_s3, %s579_s9  ;;  %s47_s29 = int_to_ptr.vmem [resolvable:$true] %s46_s29 }
  0x26   :  { %p583_p3 = scmp.lt.u32.totalorder %s579_s9, %s752_s3 }
  0x28   :  { %p585_p4 = pnand %p583_p3, %p580_p2 }
  0x2a   :  { %588 = shalt.err (!%p585_p4)
}
  0x2b   :  { %s589_s14 = scalar_lea.vmem %s47_s29, 4096  ;;  %p594_p6 = scmp.lt.s32.totalorder %s47_s29, %s47_s29 }
  0x2c   :  { %p590_p5 = scmp.ne.s32.totalorder %s47_s29, %s589_s14  ;;  %p595_p7 = scmp.lt.s32.totalorder %s589_s14, %s589_s14 }
  0x2e   :  { %p596_p8 = por %p595_p7, %p594_p6 }
  0x30   :  { %p597_p9 = pnand %p596_p8, %p590_p5 }
  0x32   :  { %600 = shalt.err (!%p597_p9)
}
  0x33   :  { %52 = dma.hbm_to_vmem [thread:$0]  %s752_s3, 4096, %s47_s29, [#allocation6], %s633_s1, %s633_s1, %s634_s25  }
  0x34   :  { %623 = dma.done.wait [#allocation3], 256  }
  0x35   :  { %624 = vsyncadd [#allocation3], 4294967040 }
  0x36   :  { %625 = dma.done.wait [#allocation6], 8192  }
  0x37   :  { %626 = vsyncadd [#allocation6], 4294959104  ;;  %v636_v0 = vmov 0.0   ;;  %v71_v1 = vld [vmem:[#allocation5 + $0x8] sm:$0xff]  ;;  %v73_v2 = vld [vmem:[#allocation5 + $0x18] sm:$0xff]  ;;  %s637_s21 = smov [#allocation8]  }
  0x38   :  { %178 = vmatprep.mubr.f32.mxu0 %v636_v0  ;;  %v70_v3 = vld [vmem:[#allocation5] sm:$0xff]  ;;  %v442_v4 = vpack.c.bf16 %v73_v2, %v71_v1  ;;  %v72_v5 = vld [vmem:[#allocation5 + $0x10] sm:$0xff]  ;;  %v75_v6 = vld [vmem:[#allocation5 + $0x28] sm:$0xff]  ;;  %s384_s22 = sshll.u32 %s637_s21, 4  ;;  %s385_s22 = int_to_ptr.vmem [resolvable:$true] %s384_s22 }
  0x39   :  { %v77_v7 = vld [vmem:[#allocation5 + $0x38] sm:$0xff]  ;;  %v444_v8 = vpack.c.bf16 %v72_v5, %v70_v3  ;;  %v74_v10 = vld [vmem:[#allocation5 + $0x20] sm:$0xff]  ;;  %v76_v11 = vld [vmem:[#allocation5 + $0x30] sm:$0xff]  ;;  %s601_s23 = scalar_lea.vmem %s385_s22, 256  ;;  %p606_p11 = scmp.lt.s32.totalorder %s385_s22, %s385_s22 }
  0x3a   :  { %v446_v9 = vpack.c.bf16 %v77_v7, %v75_v6  ;;  %v79_v12 = vld [vmem:[#allocation5 + $0x48] sm:$0xff]  ;;  %443 = vmatprep.subr.bf16.mxu0 %v442_v4  ;;  %v81_v13 = vld [vmem:[#allocation5 + $0x58] sm:$0xff]  ;;  %v448_v14 = vpack.c.bf16 %v76_v11, %v74_v10  ;;  %v78_v16 = vld [vmem:[#allocation5 + $0x40] sm:$0xff]  ;;  %p602_p10 = scmp.ne.s32.totalorder %s385_s22, %s601_s23  ;;  %p607_p12 = scmp.lt.s32.totalorder %s601_s23, %s601_s23 }
  0x3b   :  { %445 = vmatpush1.bf16.msra.mxu0 %v444_v8  ;;  %v450_v15 = vpack.c.bf16 %v81_v13, %v79_v12  ;;  %v80_v17 = vld [vmem:[#allocation5 + $0x50] sm:$0xff]  ;;  %v83_v18 = vld [vmem:[#allocation5 + $0x68] sm:$0xff]  ;;  %v85_v19 = vld [vmem:[#allocation5 + $0x78] sm:$0xff] }
  0x3c   :  { %447 = vmatprep.subr.bf16.mxu0 %v446_v9  ;;  %v452_v20 = vpack.c.bf16 %v80_v17, %v78_v16  ;;  %v454_v21 = vpack.c.bf16 %v85_v19, %v83_v18  ;;  %v82_v22 = vld [vmem:[#allocation5 + $0x60] sm:$0xff]  ;;  %v84_v23 = vld [vmem:[#allocation5 + $0x70] sm:$0xff]  ;;  %v87_v24 = vld [vmem:[#allocation5 + $0x88] sm:$0xff]  ;;  %p608_p13 = por %p607_p12, %p606_p11 }
  0x3d   :  { %v89_v25 = vld [vmem:[#allocation5 + $0x98] sm:$0xff]  ;;  %v456_v26 = vpack.c.bf16 %v84_v23, %v82_v22  ;;  %v86_v28 = vld [vmem:[#allocation5 + $0x80] sm:$0xff]  ;;  %v88_v29 = vld [vmem:[#allocation5 + $0x90] sm:$0xff] }
  0x3e   :  { %v458_v27 = vpack.c.bf16 %v89_v25, %v87_v24  ;;  %v91_v30 = vld [vmem:[#allocation5 + $0xa8] sm:$0xff]  ;;  %v93_v31 = vld [vmem:[#allocation5 + $0xb8] sm:$0xff]  ;;  %v460_v32 = vpack.c.bf16 %v88_v29, %v86_v28  ;;  %v90_v34 = vld [vmem:[#allocation5 + $0xa0] sm:$0xff]  ;;  %p609_p0 = pnand %p608_p13, %p602_p10 }
  0x3f   :  { %449 = vmatpush1.bf16.msra.mxu0 %v448_v14  ;;  %v462_v33 = vpack.c.bf16 %v93_v31, %v91_v30  ;;  %v92_v35 = vld [vmem:[#allocation5 + $0xb0] sm:$0xff]  ;;  %v95_v36 = vld [vmem:[#allocation5 + $0xc8] sm:$0xff]  ;;  %v97_v37 = vld [vmem:[#allocation5 + $0xd8] sm:$0xff] }
  0x40   :  { %451 = vmatprep.subr.bf16.mxu0 %v450_v15  ;;  %v464_v38 = vpack.c.bf16 %v92_v35, %v90_v34  ;;  %v466_v39 = vpack.c.bf16 %v97_v37, %v95_v36  ;;  %v94_v40 = vld [vmem:[#allocation5 + $0xc0] sm:$0xff]  ;;  %v96_v41 = vld [vmem:[#allocation5 + $0xd0] sm:$0xff]  ;;  %v99_v42 = vld [vmem:[#allocation5 + $0xe8] sm:$0xff]  ;;  %v104_v35 = vlaneseq }
  0x41   :  { %v101_v43 = vld [vmem:[#allocation5 + $0xf8] sm:$0xff]  ;;  %v468_v44 = vpack.c.bf16 %v96_v41, %v94_v40  ;;  %v98_v46 = vld [vmem:[#allocation5 + $0xe0] sm:$0xff]  ;;  %v100_v47 = vld [vmem:[#allocation5 + $0xf0] sm:$0xff] }
  0x42   :  { %v470_v45 = vpack.c.bf16 %v101_v43, %v99_v42  ;;  %v472_v48 = vpack.c.bf16 %v100_v47, %v98_v46  ;;  %v68_v49 = vld [vmem:[#allocation2] sm:$0xff]  ;;  %v69_v50 = vld [vmem:[#allocation2 + $0x8] sm:$0xff]  ;;  %v235_v51 = vld [vmem:[#allocation7 + $0x80] sm:$0xff]  ;;  %v105_v36 = vshrl.u32 %v104_v35, 7 }
  0x43   :  { %453 = vmatpush1.bf16.msra.mxu0 %v452_v20  ;;  %v236_v52 = vld [vmem:[#allocation7 + $0x88] sm:$0xff]  ;;  %v219_v54 = vld [vmem:[#allocation7] sm:$0xff]  ;;  %v237_v57 = vld [vmem:[#allocation7 + $0x90] sm:$0xff] }
  0x44   :  { %455 = vmatprep.subr.bf16.mxu0 %v454_v21  ;;  %v474_v53 = vpack.c.bf16 %v236_v52, %v235_v51  ;;  %v220_v55 = vld [vmem:[#allocation7 + $0x8] sm:$0xff]  ;;  %v238_v58 = vld [vmem:[#allocation7 + $0x98] sm:$0xff]  ;;  %v221_v60 = vld [vmem:[#allocation7 + $0x10] sm:$0xff]  ;;  %v106_v37 = vsub.s32 0, %v105_v36 }
  0x45   :  { %v476_v56 = vpack.c.bf16 %v220_v55, %v219_v54  ;;  %v478_v59 = vpack.c.bf16 %v238_v58, %v237_v57  ;;  %v222_v61 = vld [vmem:[#allocation7 + $0x18] sm:$0xff]  ;;  %v239_v63 = vld [vmem:[#allocation7 + $0xa0] sm:$0xff]  ;;  %v224_v3 = vld [vmem:[#allocation7 + $0x28] sm:$0xff] }
  0x46   :  { %475 = vmatprep.subr.bf16.mxu1 %v474_v53  ;;  %v480_v62 = vpack.c.bf16 %v222_v61, %v221_v60  ;;  %v223_v2 = vld [vmem:[#allocation7 + $0x20] sm:$0xff]  ;;  %v241_v5 = vld [vmem:[#allocation7 + $0xb0] sm:$0xff]  ;;  %v242_v6 = vld [vmem:[#allocation7 + $0xb8] sm:$0xff] }
  0x47   :  { %457 = vmatpush1.bf16.msra.mxu0 %v456_v26  ;;  %477 = vmatpush3.bf16.msra.mxu1 %v476_v56  ;;  %v484_v4 = vpack.c.bf16 %v224_v3, %v223_v2  ;;  %v486_v7 = vpack.c.bf16 %v242_v6, %v241_v5  ;;  %v225_v8 = vld [vmem:[#allocation7 + $0x30] sm:$0xff]  ;;  %v226_v9 = vld [vmem:[#allocation7 + $0x38] sm:$0xff]  ;;  %v243_v11 = vld [vmem:[#allocation7 + $0xc0] sm:$0xff] }
  0x48   :  { %459 = vmatprep.subr.bf16.mxu0 %v458_v27  ;;  %479 = vmatprep.subr.bf16.mxu1 %v478_v59  ;;  %v488_v10 = vpack.c.bf16 %v226_v9, %v225_v8  ;;  %v244_v12 = vld [vmem:[#allocation7 + $0xc8] sm:$0xff]  ;;  %v227_v14 = vld [vmem:[#allocation7 + $0x40] sm:$0xff]  ;;  %v245_v17 = vld [vmem:[#allocation7 + $0xd0] sm:$0xff] }
  0x49   :  { %v490_v13 = vpack.c.bf16 %v244_v12, %v243_v11  ;;  %v228_v15 = vld [vmem:[#allocation7 + $0x48] sm:$0xff]  ;;  %v246_v18 = vld [vmem:[#allocation7 + $0xd8] sm:$0xff]  ;;  %v229_v20 = vld [vmem:[#allocation7 + $0x50] sm:$0xff] }
  0x4a   :  { %v492_v16 = vpack.c.bf16 %v228_v15, %v227_v14  ;;  %v494_v19 = vpack.c.bf16 %v246_v18, %v245_v17  ;;  %v230_v21 = vld [vmem:[#allocation7 + $0x58] sm:$0xff]  ;;  %v247_v23 = vld [vmem:[#allocation7 + $0xe0] sm:$0xff]  ;;  %v248_v24 = vld [vmem:[#allocation7 + $0xe8] sm:$0xff] }
  0x4b   :  { %461 = vmatpush1.bf16.msra.mxu0 %v460_v32  ;;  %481 = vmatpush3.bf16.msra.mxu1 %v480_v62  ;;  %v496_v22 = vpack.c.bf16 %v230_v21, %v229_v20  ;;  %v498_v25 = vpack.c.bf16 %v248_v24, %v247_v23  ;;  %v231_v26 = vld [vmem:[#allocation7 + $0x60] sm:$0xff]  ;;  %v232_v27 = vld [vmem:[#allocation7 + $0x68] sm:$0xff]  ;;  %v249_v29 = vld [vmem:[#allocation7 + $0xf0] sm:$0xff] }
  0x4c   :  { %463 = vmatprep.subr.bf16.mxu0 %v462_v33  ;;  %v500_v28 = vpack.c.bf16 %v232_v27, %v231_v26  ;;  %v250_v30 = vld [vmem:[#allocation7 + $0xf8] sm:$0xff]  ;;  %v233_v32 = vld [vmem:[#allocation7 + $0x70] sm:$0xff] }
  0x4d   :  { %v502_v31 = vpack.c.bf16 %v250_v30, %v249_v29  ;;  %v234_v33 = vld [vmem:[#allocation7 + $0x78] sm:$0xff]  ;;  %v403_v35 = vld [vmem:[%s755_s6] ss:$0 sm:$0xff] }
  0x4e   :  { %v504_v34 = vpack.c.bf16 %v234_v33, %v233_v32  ;;  %v402_v33 = vld [vmem:[%s754_s5] ss:$0 sm:$0xff] }
  0x4f   :  { %465 = vmatpush1.bf16.msra.mxu0 %v464_v38  ;;  %v102_v38 = vld [vmem:[%s751_s2] sm:$0x3] }
  0x50   :  { %467 = vmatprep.subr.bf16.mxu0 %v466_v39  ;;  %v110_v39 = vsub.s32 1, %v105_v36  ;;  %v107_v40 = vrot.slane %v102_v38, %v106_v37 }
  0x52   :  { %v111_v41 = vrot.slane %v102_v38, %v110_v39 }
  0x53   :  { %469 = vmatpush1.bf16.msra.mxu0 %v468_v44 }
  0x54   :  { %471 = vmatprep.subr.bf16.mxu0 %v470_v45 }
  0x57   :  { %473 = vmatpush1.bf16.msra.mxu0 %v472_v48 }
  0x5a   :  { %179 = vmatmul.mubr.f32.vlgmr.msra.gmra.mrb[0].mxu0 %v68_v49 }
  0x5b   :  { %184 = vmatprep.mubr.f32.mxu0 %v636_v0  ;;  %v240_v0 = vld [vmem:[#allocation7 + $0xa8] sm:$0xff] }
  0x5c   :  { %v482_v1 = vpack.c.bf16 %v240_v0, %v239_v63 }
  0x5e   :  { %185 = vmatmul.mubr.f32.gmra.mrb[2].mxu0 %v69_v50  ;;  %483 = vmatprep.subr.bf16.mxu1 %v482_v1 }
  0x5f   :  { %485 = vmatpush3.bf16.msra.mxu1 %v484_v4 }
  0x60   :  { %487 = vmatprep.subr.bf16.mxu1 %v486_v7  ;;  %v401_v7 = vld [vmem:[%s753_s4] ss:$0 sm:$0xff] }
  0x63   :  { %489 = vmatpush3.bf16.msra.mxu1 %v488_v10 }
  0x64   :  { %491 = vmatprep.subr.bf16.mxu1 %v490_v13 }
  0x67   :  { %493 = vmatpush3.bf16.msra.mxu1 %v492_v16 }
  0x68   :  { %495 = vmatprep.subr.bf16.mxu1 %v494_v19 }
  0x6b   :  { %497 = vmatpush3.bf16.msra.mxu1 %v496_v22 }
  0x6c   :  { %499 = vmatprep.subr.bf16.mxu1 %v498_v25 }
  0x6f   :  { %501 = vmatpush3.bf16.msra.mxu1 %v500_v28 }
  0x70   :  { %503 = vmatprep.subr.bf16.mxu1 %v502_v31 }
  0x73   :  { %505 = vmatpush3.bf16.msra.mxu1 %v504_v34 }
 0x12d   :  { %v180_v42 = vpop.f32.mrb[0].mxu0 }
 0x12e   :  { %v181_v43 = vadd.f32 %v180_v42, %v107_v40  ;;  %v182_v44 = vpop.f32.mrb[1].mxu0 }
 0x12f   :  { %v183_v45 = vadd.f32 %v182_v44, %v111_v41 }
 0x130   :  { %v397_v46 = vmul.f32 -1.442695, %v181_v43 }
 0x131   :  { %v398_v47 = vmul.f32 -1.442695, %v183_v45  ;;  %v186_v48 = vpop.f32.mrb[2].mxu0 }
 0x132   :  { %515 = vpow2.f32 %v397_v46  ;;  %v187_v49 = vadd.f32 %v186_v48, %v107_v40  ;;  %v188_v50 = vpop.f32.mrb[3].mxu0 }
 0x133   :  { %517 = vpow2.f32 %v398_v47  ;;  %v189_v51 = vadd.f32 %v188_v50, %v111_v41 }
 0x134   :  { %v399_v52 = vmul.f32 -1.442695, %v187_v49 }
 0x135   :  { %v400_v53 = vmul.f32 -1.442695, %v189_v51 }
 0x136   :  { %519 = vpow2.f32 %v399_v52 }
 0x137   :  { %521 = vpow2.f32 %v400_v53 }
 0x13c   :  { %v516_v54 = vpop.eup %515 }
 0x13d   :  { %v518_v55 = vpop.eup %517  ;;  %v203_v56 = vadd.f32 1.0, %v516_v54 }
 0x13e   :  { %v204_v57 = vadd.f32 1.0, %v518_v55 }
 0x13f   :  { %523 = vrcp.f32 %v203_v56 }
 0x140   :  { %v520_v58 = vpop.eup %519  ;;  %525 = vrcp.f32 %v204_v57 }
 0x141   :  { %v522_v59 = vpop.eup %521  ;;  %v205_v60 = vadd.f32 1.0, %v520_v58 }
 0x142   :  { %v206_v61 = vadd.f32 1.0, %v522_v59 }
 0x143   :  { %527 = vrcp.f32 %v205_v60 }
 0x144   :  { %529 = vrcp.f32 %v206_v61 }
 0x149   :  { %v524_v62 = vpop.eup %523 }
 0x14a   :  { %v526_v63 = vpop.eup %525  ;;  %v215_v1 = vmul.f32 %v524_v62, %v181_v43 }
 0x14b   :  { %v216_v0 = vmul.f32 %v526_v63, %v183_v45 }
 0x14d   :  { %v528_v2 = vpop.eup %527  ;;  %322 = vmatprep.mubr.f32.mxu1 %v216_v0 }
 0x14e   :  { %v530_v3 = vpop.eup %529  ;;  %323 = vmatmul.mubr.f32.vlgmr.msra.gmra.mrb[0].mxu1 %v215_v1  ;;  %v217_v5 = vmul.f32 %v528_v2, %v187_v49 }
 0x14f   :  { %v218_v4 = vmul.f32 %v530_v3, %v189_v51 }
 0x151   :  { %327 = vmatprep.mubr.f32.mxu1 %v218_v4 }
 0x152   :  { %328 = vmatmul.mubr.f32.gmra.mrb[2].mxu1 %v217_v5 }
 0x221   :  { %v436_v6 = vpop.f32.mrb[0].mxu1 }
 0x222   :  { %v437_v8 = vpop.f32.mrb[1].mxu1 }
 0x223   :  { %v438_v9 = vadd.f32 %v437_v8, %v436_v6 }
 0x225   :  { %v325_v10 = vadd.f32 %v438_v9, %v401_v7  ;;  %v439_v11 = vpop.f32.mrb[2].mxu1 }
 0x226   :  { %v440_v12 = vpop.f32.mrb[3].mxu1 }
 0x227   :  { %v441_v13 = vadd.f32 %v440_v12, %v439_v11  ;;  %335 = vadd.xlane.f32.xlu0 %v325_v10  ;;  %v339_v14 = vmul.f32 %v325_v10, %v325_v10 }
 0x229   :  { %v330_v15 = vadd.f32 %v441_v13, %v401_v7  ;;  %341 = vadd.xlane.f32.xlu1 %v339_v14 }
 0x22b   :  { %337 = vadd.xlane.f32.xlu0 %v330_v15  ;;  %v340_v16 = vmul.f32 %v330_v15, %v330_v15 }
 0x22d   :  { %343 = vadd.xlane.f32.xlu1 %v340_v16 }
 0x2b4   :  { %v336_v17 = vpop.xlane.xlu0 %335 }
 0x2b5   :  { %v345_v18 = vmul.f32 0.0078125, %v336_v17 }
 0x2b6   :  { %v342_v19 = vpop.xlane.xlu1 %341 }
 0x2b7   :  { %v349_v20 = vmul.f32 %v345_v18, %v345_v18  ;;  %v347_v21 = vmul.f32 0.0078125, %v342_v19  ;;  %v353_v31 = vsub.f32 %v325_v10, %v345_v18 }
 0x2b8   :  { %v338_v22 = vpop.xlane.xlu0 %337 }
 0x2b9   :  { %v351_v23 = vsub.f32 %v347_v21, %v349_v20  ;;  %v346_v24 = vmul.f32 0.0078125, %v338_v22 }
 0x2ba   :  { %v344_v25 = vpop.xlane.xlu1 %343 }
 0x2bb   :  { %v355_v26 = vadd.f32 1e-05, %v351_v23  ;;  %v350_v27 = vmul.f32 %v346_v24, %v346_v24  ;;  %v348_v28 = vmul.f32 0.0078125, %v344_v25  ;;  %v354_v36 = vsub.f32 %v330_v15, %v346_v24 }
 0x2bd   :  { %531 = vrsqrt.f32 %v355_v26  ;;  %v352_v29 = vsub.f32 %v348_v28, %v350_v27 }
 0x2bf   :  { %v356_v30 = vadd.f32 1e-05, %v352_v29 }
 0x2c1   :  { %533 = vrsqrt.f32 %v356_v30 }
 0x2c7   :  { %v532_v32 = vpop.eup %531 }
 0x2c8   :  { %v359_v34 = vmul.f32 %v532_v32, %v353_v31 }
 0x2ca   :  { %v367_v37 = vmul.f32 %v402_v33, %v359_v34 }
 0x2cb   :  { %v534_v38 = vpop.eup %533 }
 0x2cc   :  { %v360_v39 = vmul.f32 %v534_v38, %v354_v36  ;;  %v375_v40 = vadd.f32 %v403_v35, %v367_v37 }
 0x2ce   :  { %v368_v41 = vmul.f32 %v402_v33, %v360_v39  ;;  %377 = vst [vmem:[#allocation8] sm:$0xff] %v375_v40 }
 0x2d0   :  { %v376_v42 = vadd.f32 %v403_v35, %v368_v41 }
 0x2d2   :  { %378 = vst [vmem:[#allocation8 + $0x8] sm:$0xff] %v376_v42 }
 0x2d3   :  { %612 = shalt.err (!%p609_p0)
}
 0x2d4   :  { %s613_s24 = scalar_lea.hbm %s756_s7, 256 }
 0x2d5   :  { %p614_p1 = scmp.ne.s32.totalorder %s756_s7, %s613_s24  ;;  %p617_p2 = scmp.lt.u32.totalorder %s613_s24, %s756_s7 }
 0x2d7   :  { %p619_p3 = pnand %p617_p2, %p614_p1 }
 0x2d9   :  { %622 = shalt.err (!%p619_p3)
}
 0x2da   :  { %390 = dma.vmem_to_hbm [thread:$0]  %s385_s22, 256, %s756_s7, [#allocation4], %s633_s1, %s633_s1, %s634_s25  }
 0x2db   :  { %627 = dma.done.wait [#allocation4], 256  }
 0x2dc   :  { %628 = vsyncadd [#allocation4], 4294967040 }
 0x2dd   :  { %394 = vsyncpa [#allocation3], 1 }
 0x2de   :  { %395 = vsyncpa [#allocation6], 1 }
 0x2df   :  { %396 = vsyncpa [#allocation4], 1 }

</bundles_post_ra>
